<compile_context>
chip_gen: v6e
topology: v6e:2x2x1
jax: 0.10.0
libtpu: 0.0.40
codegen_flags: <defaults>
</compile_context>

<pallas_src>
import functools

import jax
import jax.numpy as jnp
from jax import lax
from jax.experimental import pallas as pl
from jax.experimental.pallas import tpu as pltpu


def _attention_lstm_kernel(
    support_ref,        # (S, D)   matmul dtype
    support_t_ref,      # (D, S)   matmul dtype (host-transposed, loop-invariant)
    queries_ref,        # (TQ, D)  f32
    wx_ref,             # (D, 4D)  matmul dtype  == W_ih.T, columns [i|f|g|o]
    wh_ref,             # (D, 4D)  matmul dtype  == W_hh.T, columns [i|f|g|o]
    b_ref,              # (1, 4D)  f32           == b_ih + b_hh
    out_ref,            # (TQ, D)
    *, unrolling_steps: int, hidden_dim: int, approx_recip: bool,
):
    D = hidden_dim
    mm_dtype = wx_ref.dtype                      # MXU operand dtype (f32 or bf16)

    queries = queries_ref[...].astype(jnp.float32)           # (TQ, D), f32 everywhere
    queries_mm = queries.astype(mm_dtype)

    # Input-side gate pre-activations: ONE fused lane-dense matmul, computed once
    # (queries are constant across unrolling steps).  (TQ, 4D), f32.
    xgates = (
        jnp.dot(queries_mm, wx_ref[...], preferred_element_type=jnp.float32)
        + b_ref[...].astype(jnp.float32)
    )

    zeros = jnp.zeros_like(queries)

    def step(_, carry):
        h_hat, c = carry
        h = h_hat + queries                                   # (TQ, D), f32
        h_mm = h.astype(mm_dtype)

        # attention = softmax(h @ support.T, dim=1); normalization folded into readout.
        scores = jnp.dot(h_mm, support_t_ref[...],
                         preferred_element_type=jnp.float32)  # (TQ, S)
        scores = scores - jnp.max(scores, axis=-1, keepdims=True)
        e = jnp.exp(scores)
        inv_denom = pl.reciprocal(jnp.sum(e, axis=-1, keepdims=True),
                                  approx=approx_recip)        # (TQ, 1)
        readout = jnp.dot(e.astype(mm_dtype), support_ref[...],
                          preferred_element_type=jnp.float32) * inv_denom   # (TQ, D)

        h_in = h + readout                                    # hidden state fed to the cell

        # nn.LSTMCell(queries, (h_in, c)) -- single fused hidden-side matmul.
        gates = xgates + jnp.dot(h_in.astype(mm_dtype), wh_ref[...],
                                 preferred_element_type=jnp.float32)        # (TQ, 4D)
        i_g = jax.nn.sigmoid(gates[:, 0 * D:1 * D])
        f_g = jax.nn.sigmoid(gates[:, 1 * D:2 * D])
        g_g = jnp.tanh(gates[:, 2 * D:3 * D])
        o_g = jax.nn.sigmoid(gates[:, 3 * D:4 * D])

        c_new = f_g * c + i_g * g_g
        h_new = o_g * jnp.tanh(c_new)
        return h_new, c_new

    h_hat, _ = lax.fori_loop(0, unrolling_steps, step, (zeros, zeros), unroll=True)
    out_ref[...] = (h_hat + queries).astype(out_ref.dtype)


def attention_lstm(support, queries, params, unrolling_steps: int,
                   *, matmul_dtype=jnp.float32, approx_softmax_recip: bool = False,
                   query_block: int | None = None):
    """support: (S, D), queries: (Q, D). params: PyTorch-convention LSTMCell weights."""
    if support.shape[-1] != queries.shape[-1]:
        raise ValueError('Support/query embedding dims differ!')
    S, D = support.shape
    Q = queries.shape[0]

    w_ih = params["w_ih"]          # (4D, D)  [i, f, g, o] stacked (PyTorch convention)
    w_hh = params["w_hh"]          # (4D, D)
    b_ih = params["b_ih"]          # (4D,)
    b_hh = params["b_hh"]          # (4D,)

    # Fused + pre-transposed weights: x @ W_ih.T -> one (D, 4D) operand, same for W_hh.
    wx = w_ih.T.astype(matmul_dtype)                           # (D, 4D), columns [i|f|g|o]
    wh = w_hh.T.astype(matmul_dtype)                           # (D, 4D)
    b = (b_ih + b_hh).reshape(1, 4 * D).astype(jnp.float32)    # (1, 4D)

    support_mm = support.astype(matmul_dtype)                  # (S, D)
    support_t = support.T.astype(matmul_dtype)                 # (D, S), transpose paid once on host
    queries_f32 = queries.astype(jnp.float32)                  # activations stay f32

    # Query-dimension grid: shards across v7x's two TensorCores, single block otherwise.
    if query_block is None:
        query_block = Q
        for cand in (512, 256, 128):
            if Q > cand and Q % cand == 0:
                query_block = cand
                break
    TQ = min(query_block, Q)
    if Q % TQ != 0:
        TQ = Q
    grid = (Q // TQ,)

    kernel = functools.partial(
        _attention_lstm_kernel,
        unrolling_steps=unrolling_steps,
        hidden_dim=D,
        approx_recip=approx_softmax_recip,
    )

    out = pl.pallas_call(
        kernel,
        out_shape=jax.ShapeDtypeStruct((Q, D), queries.dtype),
        grid=grid,
        in_specs=[
            pl.BlockSpec((S, D), lambda i: (0, 0)),        # support (replicated)
            pl.BlockSpec((D, S), lambda i: (0, 0)),        # support_T (replicated)
            pl.BlockSpec((TQ, D), lambda i: (i, 0)),       # queries (tiled over Q)
            pl.BlockSpec((D, 4 * D), lambda i: (0, 0)),    # W_ih.T fused
            pl.BlockSpec((D, 4 * D), lambda i: (0, 0)),    # W_hh.T fused
            pl.BlockSpec((1, 4 * D), lambda i: (0, 0)),    # combined bias
        ],
        out_specs=pl.BlockSpec((TQ, D), lambda i: (i, 0)),
        compiler_params=pltpu.CompilerParams(dimension_semantics=("parallel",)),
    )(support_mm, support_t, queries_f32, wx, wh, b)
    return out


def _reference(support, queries, params, unrolling_steps):
    """Pure-JAX reference reproducing the PyTorch forward semantics."""
    D = queries.shape[-1]
    w_ih, w_hh, b_ih, b_hh = params["w_ih"], params["w_hh"], params["b_ih"], params["b_hh"]
    h_hat = jnp.zeros_like(queries)
    c = jnp.zeros_like(queries)
    for _ in range(unrolling_steps):
        h = h_hat + queries
        attn = jax.nn.softmax(h @ support.T, axis=1)
        readout = attn @ support
        hx = h + readout
        gates = queries @ w_ih.T + b_ih + hx @ w_hh.T + b_hh
        i_g = jax.nn.sigmoid(gates[:, 0 * D:1 * D])
        f_g = jax.nn.sigmoid(gates[:, 1 * D:2 * D])
        g_g = jnp.tanh(gates[:, 2 * D:3 * D])
        o_g = jax.nn.sigmoid(gates[:, 3 * D:4 * D])
        c = f_g * c + i_g * g_g
        h_hat = o_g * jnp.tanh(c)
    return h_hat + queries


if __name__ == "__main__":
    # Small shapes: D (embed/hidden) = 32, support k*n = 8, queries q*k = 16.
    D = 32
    S = 8
    Q = 16
    unrolling_steps = 2

    key = jax.random.PRNGKey(0)
    k_sup, k_qry, k_wih, k_whh, k_bih, k_bhh = jax.random.split(key, 6)

    support = jax.random.normal(k_sup, (S, D), dtype=jnp.float32)
    queries = jax.random.normal(k_qry, (Q, D), dtype=jnp.float32)

    bound = 1.0 / jnp.sqrt(jnp.float32(D))
    params = {
        "w_ih": jax.random.uniform(k_wih, (4 * D, D), minval=-bound, maxval=bound, dtype=jnp.float32),
        "w_hh": jax.random.uniform(k_whh, (4 * D, D), minval=-bound, maxval=bound, dtype=jnp.float32),
        "b_ih": jax.random.uniform(k_bih, (4 * D,), minval=-bound, maxval=bound, dtype=jnp.float32),
        "b_hh": jax.random.uniform(k_bhh, (4 * D,), minval=-bound, maxval=bound, dtype=jnp.float32),
    }

    ref = _reference(support, queries, params, unrolling_steps)

    # Exact (f32 MXU operands) path: tight correctness check.
    out = attention_lstm(support, queries, params, unrolling_steps)
    out = jax.block_until_ready(out)
    assert out.shape == (Q, D) and out.dtype == queries.dtype
    assert jnp.allclose(out, ref, atol=1e-4, rtol=1e-4), "f32 kernel mismatch vs reference"

    # Fast path (v6e/v7x): bf16 MXU operands + approx EUP reciprocal, f32 accumulate/gates.
    out_fast = attention_lstm(support, queries, params, unrolling_steps,
                              matmul_dtype=jnp.bfloat16, approx_softmax_recip=True)
    out_fast = jax.block_until_ready(out_fast)
    assert out_fast.shape == (Q, D)
    assert bool(jnp.max(jnp.abs(out_fast - ref)) < 0.15), "bf16 kernel diverged from reference"

    print("KERNEL_OK")
</pallas_src>

<mosaic_0001>
module attributes {stable_mosaic.version = 11 : i64} {
  func.func @_attention_lstm_kernel(%arg0: i32, %arg1: memref<8x32xf32, #tpu.memory_space<vmem>>, %arg2: memref<32x8xf32, #tpu.memory_space<vmem>>, %arg3: memref<16x32xf32, #tpu.memory_space<vmem>>, %arg4: memref<32x128xf32, #tpu.memory_space<vmem>>, %arg5: memref<32x128xf32, #tpu.memory_space<vmem>>, %arg6: memref<1x128xf32, #tpu.memory_space<vmem>>, %arg7: memref<16x32xf32, #tpu.memory_space<vmem>>) attributes {dimension_semantics = [#tpu.dimension_semantics<parallel>], iteration_bounds = array<i64: 1>, scalar_prefetch = 0 : i64, scratch_operands = 0 : i64, tpu.core_type = #tpu.core_type<tc>, window_params = [{pipeline_mode = #tpu.pipeline_mode<synchronous>, transform_indices = @transform_0, window_bounds = array<i64: 8, 32>}, {pipeline_mode = #tpu.pipeline_mode<synchronous>, transform_indices = @transform_1, window_bounds = array<i64: 32, 8>}, {transform_indices = @transform_2, window_bounds = array<i64: 16, 32>}, {pipeline_mode = #tpu.pipeline_mode<synchronous>, transform_indices = @transform_3, window_bounds = array<i64: 32, 128>}, {pipeline_mode = #tpu.pipeline_mode<synchronous>, transform_indices = @transform_4, window_bounds = array<i64: 32, 128>}, {pipeline_mode = #tpu.pipeline_mode<synchronous>, transform_indices = @transform_5, window_bounds = array<i64: 1, 128>}, {transform_indices = @transform_6, window_bounds = array<i64: 16, 32>}]} {
    %c0 = arith.constant 0 : index
    %c0_0 = arith.constant 0 : index
    %0 = vector.load %arg3[%c0, %c0_0] : memref<16x32xf32, #tpu.memory_space<vmem>>, vector<16x32xf32>
    %c0_1 = arith.constant 0 : index
    %c0_2 = arith.constant 0 : index
    %1 = vector.load %arg4[%c0_1, %c0_2] : memref<32x128xf32, #tpu.memory_space<vmem>>, vector<32x128xf32>
    %cst = arith.constant dense<0.000000e+00> : vector<16x128xf32>
    %2 = tpu.matmul %0, %1, %cst {dimension_numbers = #tpu.dot_dimension_numbers<[1], [0], [0], [1], [0, 0, 1, 1], [], []>} : vector<16x32xf32>, vector<32x128xf32>, vector<16x128xf32> -> vector<16x128xf32>
    %c0_3 = arith.constant 0 : index
    %c0_4 = arith.constant 0 : index
    %3 = vector.load %arg6[%c0_3, %c0_4] : memref<1x128xf32, #tpu.memory_space<vmem>>, vector<1x128xf32>
    %4 = vector.broadcast %3 : vector<1x128xf32> to vector<16x128xf32>
    %5 = arith.addf %2, %4 : vector<16x128xf32>
    %cst_5 = arith.constant 0.000000e+00 : f32
    %6 = vector.broadcast %cst_5 : f32 to vector<16x32xf32>
    %c0_i32 = arith.constant 0 : i32
    %7 = arith.addf %6, %0 : vector<16x32xf32>
    %c0_6 = arith.constant 0 : index
    %c0_7 = arith.constant 0 : index
    %8 = vector.load %arg2[%c0_6, %c0_7] : memref<32x8xf32, #tpu.memory_space<vmem>>, vector<32x8xf32>
    %cst_8 = arith.constant dense<0.000000e+00> : vector<16x8xf32>
    %9 = tpu.matmul %7, %8, %cst_8 {dimension_numbers = #tpu.dot_dimension_numbers<[1], [0], [0], [1], [0, 0, 1, 1], [], []>} : vector<16x32xf32>, vector<32x8xf32>, vector<16x8xf32> -> vector<16x8xf32>
    %cst_9 = arith.constant dense<0xFF800000> : vector<16xf32>
    %10 = vector.multi_reduction <maximumf>, %9, %cst_9 [1] : vector<16x8xf32> to vector<16xf32>
    %11 = vector.shape_cast %10 : vector<16xf32> to vector<16x1xf32>
    %12 = vector.broadcast %11 : vector<16x1xf32> to vector<16x8xf32>
    %13 = arith.subf %9, %12 : vector<16x8xf32>
    %14 = math.exp %13 : vector<16x8xf32>
    %cst_10 = arith.constant dense<0.000000e+00> : vector<16xf32>
    %15 = vector.multi_reduction <add>, %14, %cst_10 [1] : vector<16x8xf32> to vector<16xf32>
    %16 = vector.shape_cast %15 : vector<16xf32> to vector<16x1xf32>
    %17 = tpu.reciprocal %16 : vector<16x1xf32> -> vector<16x1xf32>
    %c0_11 = arith.constant 0 : index
    %c0_12 = arith.constant 0 : index
    %18 = vector.load %arg1[%c0_11, %c0_12] : memref<8x32xf32, #tpu.memory_space<vmem>>, vector<8x32xf32>
    %cst_13 = arith.constant dense<0.000000e+00> : vector<16x32xf32>
    %19 = tpu.matmul %14, %18, %cst_13 {dimension_numbers = #tpu.dot_dimension_numbers<[1], [0], [0], [1], [0, 0, 1, 1], [], []>} : vector<16x8xf32>, vector<8x32xf32>, vector<16x32xf32> -> vector<16x32xf32>
    %20 = vector.broadcast %17 : vector<16x1xf32> to vector<16x32xf32>
    %21 = arith.mulf %19, %20 : vector<16x32xf32>
    %22 = arith.addf %7, %21 : vector<16x32xf32>
    %c0_14 = arith.constant 0 : index
    %c0_15 = arith.constant 0 : index
    %23 = vector.load %arg5[%c0_14, %c0_15] : memref<32x128xf32, #tpu.memory_space<vmem>>, vector<32x128xf32>
    %cst_16 = arith.constant dense<0.000000e+00> : vector<16x128xf32>
    %24 = tpu.matmul %22, %23, %cst_16 {dimension_numbers = #tpu.dot_dimension_numbers<[1], [0], [0], [1], [0, 0, 1, 1], [], []>} : vector<16x32xf32>, vector<32x128xf32>, vector<16x128xf32> -> vector<16x128xf32>
    %25 = arith.addf %5, %24 : vector<16x128xf32>
    %26 = vector.extract_strided_slice %25 {offsets = [0, 0], sizes = [16, 32], strides = [1, 1]} : vector<16x128xf32> to vector<16x32xf32>
    %27 = arith.negf %26 : vector<16x32xf32>
    %28 = math.exp %27 : vector<16x32xf32>
    %cst_17 = arith.constant 1.000000e+00 : f32
    %29 = vector.broadcast %cst_17 : f32 to vector<16x32xf32>
    %30 = arith.addf %29, %28 : vector<16x32xf32>
    %31 = arith.divf %29, %30 : vector<16x32xf32>
    %32 = vector.extract_strided_slice %25 {offsets = [0, 32], sizes = [16, 32], strides = [1, 1]} : vector<16x128xf32> to vector<16x32xf32>
    %33 = arith.negf %32 : vector<16x32xf32>
    %34 = math.exp %33 : vector<16x32xf32>
    %cst_18 = arith.constant 1.000000e+00 : f32
    %35 = vector.broadcast %cst_18 : f32 to vector<16x32xf32>
    %36 = arith.addf %35, %34 : vector<16x32xf32>
    %37 = arith.divf %35, %36 : vector<16x32xf32>
    %38 = vector.extract_strided_slice %25 {offsets = [0, 64], sizes = [16, 32], strides = [1, 1]} : vector<16x128xf32> to vector<16x32xf32>
    %39 = math.tanh %38 : vector<16x32xf32>
    %40 = vector.extract_strided_slice %25 {offsets = [0, 96], sizes = [16, 32], strides = [1, 1]} : vector<16x128xf32> to vector<16x32xf32>
    %41 = arith.negf %40 : vector<16x32xf32>
    %42 = math.exp %41 : vector<16x32xf32>
    %cst_19 = arith.constant 1.000000e+00 : f32
    %43 = vector.broadcast %cst_19 : f32 to vector<16x32xf32>
    %44 = arith.addf %43, %42 : vector<16x32xf32>
    %45 = arith.divf %43, %44 : vector<16x32xf32>
    %46 = arith.mulf %37, %6 : vector<16x32xf32>
    %47 = arith.mulf %31, %39 : vector<16x32xf32>
    %48 = arith.addf %46, %47 : vector<16x32xf32>
    %49 = math.tanh %48 : vector<16x32xf32>
    %50 = arith.mulf %45, %49 : vector<16x32xf32>
    %c1_i32 = arith.constant 1 : i32
    %51 = arith.addf %50, %0 : vector<16x32xf32>
    %c0_20 = arith.constant 0 : index
    %c0_21 = arith.constant 0 : index
    %52 = vector.load %arg2[%c0_20, %c0_21] : memref<32x8xf32, #tpu.memory_space<vmem>>, vector<32x8xf32>
    %cst_22 = arith.constant dense<0.000000e+00> : vector<16x8xf32>
    %53 = tpu.matmul %51, %52, %cst_22 {dimension_numbers = #tpu.dot_dimension_numbers<[1], [0], [0], [1], [0, 0, 1, 1], [], []>} : vector<16x32xf32>, vector<32x8xf32>, vector<16x8xf32> -> vector<16x8xf32>
    %cst_23 = arith.constant dense<0xFF800000> : vector<16xf32>
    %54 = vector.multi_reduction <maximumf>, %53, %cst_23 [1] : vector<16x8xf32> to vector<16xf32>
    %55 = vector.shape_cast %54 : vector<16xf32> to vector<16x1xf32>
    %56 = vector.broadcast %55 : vector<16x1xf32> to vector<16x8xf32>
    %57 = arith.subf %53, %56 : vector<16x8xf32>
    %58 = math.exp %57 : vector<16x8xf32>
    %cst_24 = arith.constant dense<0.000000e+00> : vector<16xf32>
    %59 = vector.multi_reduction <add>, %58, %cst_24 [1] : vector<16x8xf32> to vector<16xf32>
    %60 = vector.shape_cast %59 : vector<16xf32> to vector<16x1xf32>
    %61 = tpu.reciprocal %60 : vector<16x1xf32> -> vector<16x1xf32>
    %c0_25 = arith.constant 0 : index
    %c0_26 = arith.constant 0 : index
    %62 = vector.load %arg1[%c0_25, %c0_26] : memref<8x32xf32, #tpu.memory_space<vmem>>, vector<8x32xf32>
    %cst_27 = arith.constant dense<0.000000e+00> : vector<16x32xf32>
    %63 = tpu.matmul %58, %62, %cst_27 {dimension_numbers = #tpu.dot_dimension_numbers<[1], [0], [0], [1], [0, 0, 1, 1], [], []>} : vector<16x8xf32>, vector<8x32xf32>, vector<16x32xf32> -> vector<16x32xf32>
    %64 = vector.broadcast %61 : vector<16x1xf32> to vector<16x32xf32>
    %65 = arith.mulf %63, %64 : vector<16x32xf32>
    %66 = arith.addf %51, %65 : vector<16x32xf32>
    %c0_28 = arith.constant 0 : index
    %c0_29 = arith.constant 0 : index
    %67 = vector.load %arg5[%c0_28, %c0_29] : memref<32x128xf32, #tpu.memory_space<vmem>>, vector<32x128xf32>
    %cst_30 = arith.constant dense<0.000000e+00> : vector<16x128xf32>
    %68 = tpu.matmul %66, %67, %cst_30 {dimension_numbers = #tpu.dot_dimension_numbers<[1], [0], [0], [1], [0, 0, 1, 1], [], []>} : vector<16x32xf32>, vector<32x128xf32>, vector<16x128xf32> -> vector<16x128xf32>
    %69 = arith.addf %5, %68 : vector<16x128xf32>
    %70 = vector.extract_strided_slice %69 {offsets = [0, 0], sizes = [16, 32], strides = [1, 1]} : vector<16x128xf32> to vector<16x32xf32>
    %71 = arith.negf %70 : vector<16x32xf32>
    %72 = math.exp %71 : vector<16x32xf32>
    %cst_31 = arith.constant 1.000000e+00 : f32
    %73 = vector.broadcast %cst_31 : f32 to vector<16x32xf32>
    %74 = arith.addf %73, %72 : vector<16x32xf32>
    %75 = arith.divf %73, %74 : vector<16x32xf32>
    %76 = vector.extract_strided_slice %69 {offsets = [0, 32], sizes = [16, 32], strides = [1, 1]} : vector<16x128xf32> to vector<16x32xf32>
    %77 = arith.negf %76 : vector<16x32xf32>
    %78 = math.exp %77 : vector<16x32xf32>
    %cst_32 = arith.constant 1.000000e+00 : f32
    %79 = vector.broadcast %cst_32 : f32 to vector<16x32xf32>
    %80 = arith.addf %79, %78 : vector<16x32xf32>
    %81 = arith.divf %79, %80 : vector<16x32xf32>
    %82 = vector.extract_strided_slice %69 {offsets = [0, 64], sizes = [16, 32], strides = [1, 1]} : vector<16x128xf32> to vector<16x32xf32>
    %83 = math.tanh %82 : vector<16x32xf32>
    %84 = vector.extract_strided_slice %69 {offsets = [0, 96], sizes = [16, 32], strides = [1, 1]} : vector<16x128xf32> to vector<16x32xf32>
    %85 = arith.negf %84 : vector<16x32xf32>
    %86 = math.exp %85 : vector<16x32xf32>
    %cst_33 = arith.constant 1.000000e+00 : f32
    %87 = vector.broadcast %cst_33 : f32 to vector<16x32xf32>
    %88 = arith.addf %87, %86 : vector<16x32xf32>
    %89 = arith.divf %87, %88 : vector<16x32xf32>
    %90 = arith.mulf %81, %48 : vector<16x32xf32>
    %91 = arith.mulf %75, %83 : vector<16x32xf32>
    %92 = arith.addf %90, %91 : vector<16x32xf32>
    %93 = math.tanh %92 : vector<16x32xf32>
    %94 = arith.mulf %89, %93 : vector<16x32xf32>
    %95 = arith.addf %94, %0 : vector<16x32xf32>
    %c0_34 = arith.constant 0 : index
    %c0_35 = arith.constant 0 : index
    %96 = vector.load %arg7[%c0_34, %c0_35] : memref<16x32xf32, #tpu.memory_space<vmem>>, vector<16x32xf32>
    tpu.vector_store %arg7[%c0_34, %c0_35], %95 {strides = array<i32>} : memref<16x32xf32, #tpu.memory_space<vmem>>, vector<16x32xf32>,
    return
  }
  func.func @transform_0(%arg0: i32) -> (i32, i32) {
    %c0_i32 = arith.constant 0 : i32
    %c0_i32_0 = arith.constant 0 : i32
    %c0_i32_1 = arith.constant 0 : i32
    return %c0_i32, %c0_i32_0 : i32, i32
  }
  func.func @transform_1(%arg0: i32) -> (i32, i32) {
    %c0_i32 = arith.constant 0 : i32
    %c0_i32_0 = arith.constant 0 : i32
    %c0_i32_1 = arith.constant 0 : i32
    return %c0_i32, %c0_i32_0 : i32, i32
  }
  func.func @transform_2(%arg0: i32) -> (i32, i32) {
    %c0_i32 = arith.constant 0 : i32
    %c0_i32_0 = arith.constant 0 : i32
    return %arg0, %c0_i32 : i32, i32
  }
  func.func @transform_3(%arg0: i32) -> (i32, i32) {
    %c0_i32 = arith.constant 0 : i32
    %c0_i32_0 = arith.constant 0 : i32
    %c0_i32_1 = arith.constant 0 : i32
    return %c0_i32, %c0_i32_0 : i32, i32
  }
  func.func @transform_4(%arg0: i32) -> (i32, i32) {
    %c0_i32 = arith.constant 0 : i32
    %c0_i32_0 = arith.constant 0 : i32
    %c0_i32_1 = arith.constant 0 : i32
    return %c0_i32, %c0_i32_0 : i32, i32
  }
  func.func @transform_5(%arg0: i32) -> (i32, i32) {
    %c0_i32 = arith.constant 0 : i32
    %c0_i32_0 = arith.constant 0 : i32
    %c0_i32_1 = arith.constant 0 : i32
    return %c0_i32, %c0_i32_0 : i32, i32
  }
  func.func @transform_6(%arg0: i32) -> (i32, i32) {
    %c0_i32 = arith.constant 0 : i32
    %c0_i32_0 = arith.constant 0 : i32
    return %arg0, %c0_i32 : i32, i32
  }
}

</mosaic_0001>

<bundles_post_ra>
// kernel: tpu_custom_call.1
= control target key start
LH: loop header
LB: loop body
LE: loop exit
PB: predicated region body
PF: predicated region fallthrough
CT: control target
= control target key end

     0   :  { %11 = vsyncpa [#allocation3], 0  ;;  %s1316_s0 = inlined_call_operand.vmem [shape: f32[8,32], index: 0, kind: input, shape index: {}]   ;;  %s1317_s1 = inlined_call_operand.vmem [shape: f32[32,8], index: 1, kind: input, shape index: {}]   ;;  %s1318_s2 = inlined_call_operand.hbm [shape: f32[16,32], index: 2, kind: input, shape index: {}]   ;;  %s1319_s3 = inlined_call_operand.vmem [shape: f32[32,128], index: 3, kind: input, shape index: {}]   ;;  %s1320_s4 = inlined_call_operand.hbm [shape: f32[32,128], index: 4, kind: input, shape index: {}]   ;;  %s1321_s5 = inlined_call_operand.vmem [shape: f32[1,128], index: 5, kind: input, shape index: {}]   ;;  %s1322_s6 = inlined_call_operand.hbm [shape: f32[16,32], index: 6, kind: output, shape index: {}]  }
   0x1   :  { %12 = vsyncpa [#allocation6], 0 }
   0x2   :  { %13 = vsyncpa [#allocation4], 0  ;;  %s1089_s21 = smov [#allocation2]  }
   0x3   :  { %s23_s22 = sshll.u32 %s1089_s21, 4  ;;  %s24_s22 = int_to_ptr.vmem [resolvable:$true] %s23_s22 }
   0x4   :  { %s1031_s23 = scalar_lea.vmem %s24_s22, 256  ;;  %p1036_p1 = scmp.lt.s32.totalorder %s24_s22, %s24_s22 }
   0x5   :  { %p1032_p0 = scmp.ne.s32.totalorder %s24_s22, %s1031_s23  ;;  %p1037_p2 = scmp.lt.s32.totalorder %s1031_s23, %s1031_s23 }
   0x7   :  { %p1038_p3 = por %p1037_p2, %p1036_p1 }
   0x9   :  { %p1039_p4 = pnand %p1038_p3, %p1032_p0 }
   0xb   :  { %1042 = shalt.err (!%p1039_p4)
}
   0xc   :  { %s1090_s24 = smov 128   ;;  %s1091_s25 = smov 8  }
   0xd   :  { %29 = dma.hbm_to_vmem [thread:$0]  %s1318_s2, 256, %s24_s22, [#allocation3], %s1090_s24, %s1090_s24, %s1091_s25  }
   0xe   :  { %s1092_s28 = smov [#allocation5]  }
   0xf   :  { %s37_s29 = sshll.u32 %s1092_s28, 4  ;;  %s38_s29 = int_to_ptr.vmem [resolvable:$true] %s37_s29 }
  0x10   :  { %s1051_s30 = scalar_lea.vmem %s38_s29, 512  ;;  %p1056_p6 = scmp.lt.s32.totalorder %s38_s29, %s38_s29 }
  0x11   :  { %p1052_p5 = scmp.ne.s32.totalorder %s38_s29, %s1051_s30  ;;  %p1057_p7 = scmp.lt.s32.totalorder %s1051_s30, %s1051_s30 }
  0x13   :  { %p1058_p8 = por %p1057_p7, %p1056_p6 }
  0x15   :  { %p1059_p9 = pnand %p1058_p8, %p1052_p5 }
  0x17   :  { %1062 = shalt.err (!%p1059_p9)
}
  0x18   :  { %43 = dma.hbm_to_vmem [thread:$0]  %s1320_s4, 512, %s38_s29, [#allocation6], %s1090_s24, %s1090_s24, %s1091_s25  }
  0x19   :  { %1083 = dma.done.wait [#allocation3], 256  }
  0x1a   :  { %1084 = vsyncadd [#allocation3], 4294967040 }
  0x1b   :  { %1085 = dma.done.wait [#allocation6], 512  }
  0x1c   :  { %1086 = vsyncadd [#allocation6], 4294966784  ;;  %vm65_vm0 = vcmask 261120   ;;  %v1147_v0 = vld [vmem:[%s1317_s1 + $0x18] sm:$0xff]  ;;  %v1152_v1 = vld [vmem:[%s1317_s1 + $0x10] sm:$0xff]  ;;  %vm234_vm1 = vcmask 64512  }
  0x1d   :  { %913 = vmatprep.subr.mxu1 %v1147_v0  ;;  %v1155_v2 = vld [vmem:[#allocation2] sm:$0xff]  ;;  %v1161_v3 = vld [vmem:[%s1317_s1 + $0x8] sm:$0xff]  ;;  %v57_v21 = vld [vmem:[%s1319_s3 + $0x18] sm:$0xff]  ;;  %s1093_s26 = smov 64   ;;  %s1095_s27 = smov 96  }
  0x1e   :  { %914 = vmatpush3.msra.mxu1 %v1147_v0  ;;  %921 = vmatprep.mubr.msk.f32.mxu1 %vm65_vm0, %v1155_v2  ;;  %v1172_v4 = vld [vmem:[%s1317_s1] sm:$0xff]  ;;  %v1176_v5 = vld [vmem:[#allocation2 + $0x8] sm:$0xff]  ;;  %v56_v22 = vld [vmem:[%s1319_s3 + $0x10] sm:$0xff]  ;;  %s1096_s28 = smov [#allocation7]  }
  0x1f   :  { %915 = vmatprep.subr.mxu1 %v1152_v1  ;;  %910 = vmatprep.mubr.msk.f32.mxu0 %vm65_vm0, %v1155_v2  ;;  %v1187_v10 = vld [vmem:[%s1316_s0] sm:$0xff]  ;;  %v55_v23 = vld [vmem:[%s1319_s3 + $0x8] sm:$0xff]  ;;  %v1215_v27 = vld [vmem:[#allocation5 + $0x8] sm:$0xff]  ;;  %s834_s29 = sshll.u32 %s1096_s28, 4  ;;  %s835_s29 = int_to_ptr.vmem [resolvable:$true] %s834_s29 }
  0x20   :  { %916 = vmatpush3.msra.mxu1 %v1152_v1  ;;  %902 = vmatprep.subr.mxu0 %v57_v21  ;;  %v1204_v24 = vld [vmem:[#allocation5 + $0x18] sm:$0xff]  ;;  %v54_v25 = vld [vmem:[%s1319_s3] sm:$0xff]  ;;  %v1221_v28 = vld [vmem:[#allocation5] sm:$0xff]  ;;  %s1063_s30 = scalar_lea.vmem %s835_s29, 256  ;;  %p1068_p11 = scmp.lt.s32.totalorder %s835_s29, %s835_s29 }
  0x21   :  { %917 = vmatprep.subr.mxu1 %v1161_v3  ;;  %903 = vmatpush3.msra.mxu0 %v57_v21  ;;  %v1211_v26 = vld [vmem:[#allocation5 + $0x10] sm:$0xff]  ;;  %p1064_p10 = scmp.ne.s32.totalorder %s835_s29, %s1063_s30  ;;  %p1069_p12 = scmp.lt.s32.totalorder %s1063_s30, %s1063_s30 }
  0x22   :  { %918 = vmatpush3.msra.mxu1 %v1161_v3  ;;  %904 = vmatprep.subr.mxu0 %v56_v22  ;;  %v847_v40 = vld [vmem:[%s1321_s5] ss:$0 sm:$0xff]  ;;  %s1094_s5 = smov 32  }
  0x23   :  { %919 = vmatprep.subr.mxu1 %v1172_v4  ;;  %905 = vmatpush3.msra.mxu0 %v56_v22  ;;  %p1070_p13 = por %p1069_p12, %p1068_p11 }
  0x24   :  { %920 = vmatpush3.msra.mxu1 %v1172_v4  ;;  %906 = vmatprep.subr.mxu0 %v55_v23 }
  0x25   :  { %922 = vmatmul.mubr.msk.f32.vlgmr.msra.gmra.mxu1 %vm65_vm0, %v1176_v5  ;;  %924 = vmatprep.subr.mxu1 %v1187_v10  ;;  %p1071_p0 = pnand %p1070_p13, %p1064_p10 }
  0x26   :  { %925 = vmatpush3.msra.mxu1 %v1187_v10  ;;  %907 = vmatpush3.msra.mxu0 %v55_v23 }
  0x27   :  { %929 = vmatprep.subr.mxu1 %v1204_v24  ;;  %908 = vmatprep.subr.mxu0 %v54_v25 }
  0x28   :  { %909 = vmatpush3.msra.mxu0 %v54_v25 }
  0x29   :  { %911 = vmatmul.mubr.msk.f32.vlgmr.msra.gmra.mxu0 %vm65_vm0, %v1176_v5  ;;  %940 = vmatprep.subr.mxu0 %v1147_v0 }
  0x2a   :  { %941 = vmatpush3.msra.mxu0 %v1147_v0 }
  0x2b   :  { %942 = vmatprep.subr.mxu0 %v1152_v1 }
  0x2c   :  { %943 = vmatpush3.msra.mxu0 %v1152_v1 }
  0x2d   :  { %944 = vmatprep.subr.mxu0 %v1161_v3 }
  0x2e   :  { %945 = vmatpush3.msra.mxu0 %v1161_v3 }
  0x2f   :  { %946 = vmatprep.subr.mxu0 %v1172_v4 }
  0x30   :  { %947 = vmatpush3.msra.mxu0 %v1172_v4 }
  0x31   :  { %956 = vmatprep.subr.mxu0 %v1204_v24 }
  0xe5   :  { %v923_v6 = vpop.f32.mrf.mxu1 }
  0xe6   :  { %v238_v9 = vsel %vm234_vm1, %v923_v6, -inf }
  0xe7   :  { %v225_v7 = vpop.f32.mrf.mxu1 }
  0xe8   :  { %v235_v8 = vsel %vm234_vm1, %v225_v7, -inf }
  0xe9   :  { %236 = vmax.xlane.f32.xlu0 %v235_v8  ;;  %v912_v39 = vpop.f32.mrf.mxu0 }
  0xea   :  { %v1243_v41 = vadd.f32 %v912_v39, %v847_v40 }
  0xeb   :  { %v138_v42 = vpop.f32.mrf.mxu0 }
  0xec   :  { %v1245_v44 = vadd.f32 %v847_v40, %v138_v42 }
  0xed   :  { %239 = vmax.xlane.f32.xlu0 %v238_v9 }
 0x172   :  { %v237_v11 = vpop.xlane.xlu0 %236 }
 0x173   :  { %v241_v12 = vsub.f32 %v225_v7, %v237_v11 }
 0x175   :  { %v243_v13 = vmul.f32 1.442695, %v241_v12 }
 0x176   :  { %v240_v14 = vpop.xlane.xlu0 %239 }
 0x177   :  { %975 = vpow2.f32 %v243_v13  ;;  %v242_v15 = vsub.f32 %v923_v6, %v240_v14 }
 0x179   :  { %v245_v16 = vmul.f32 1.442695, %v242_v15 }
 0x17b   :  { %977 = vpow2.f32 %v245_v16 }
 0x184   :  { %v976_v17 = vpop.eup %975 }
 0x185   :  { %926 = vmatprep.mubr.msk.f32.mxu1 %vm234_vm1, %v976_v17  ;;  %v247_v18 = vsel %vm234_vm1, %v976_v17, 0.0 }
 0x186   :  { %248 = vadd.xlane.f32.xlu1 %v247_v18 }
 0x188   :  { %v978_v19 = vpop.eup %977 }
 0x189   :  { %927 = vmatmul.mubr.msk.f32.vlgmr.msra.gmra.mxu1 %vm234_vm1, %v978_v19  ;;  %v250_v20 = vsel %vm234_vm1, %v978_v19, 0.0 }
 0x18a   :  { %251 = vadd.xlane.f32.xlu1 %v250_v20  ;;  %930 = vmatpush3.msra.mxu1 %v1204_v24 }
 0x18b   :  { %931 = vmatprep.subr.mxu1 %v1211_v26 }
 0x18c   :  { %932 = vmatpush3.msra.mxu1 %v1211_v26 }
 0x18d   :  { %933 = vmatprep.subr.mxu1 %v1215_v27 }
 0x18e   :  { %934 = vmatpush3.msra.mxu1 %v1215_v27 }
 0x18f   :  { %935 = vmatprep.subr.mxu1 %v1221_v28 }
 0x190   :  { %936 = vmatpush3.msra.mxu1 %v1221_v28 }
 0x191   :  { %951 = vmatprep.subr.mxu1 %v1187_v10 }
 0x20f   :  { %v249_v29 = vpop.xlane.xlu1 %248 }
 0x213   :  { %v252_v30 = vpop.xlane.xlu1 %251 }
 0x214   :  { %979 = vrcp.f32 %v252_v30 }
 0x215   :  { %981 = vrcp.f32 %v249_v29 }
 0x221   :  { %v980_v32 = vpop.eup %979 }
 0x222   :  { %v982_v33 = vpop.eup %981 }
 0x249   :  { %v928_v31 = vpop.f32.mrf.mxu1 }
 0x24a   :  { %v338_v34 = vmul.f32 %v980_v32, %v928_v31 }
 0x24b   :  { %v328_v35 = vpop.f32.mrf.mxu1 }
 0x24c   :  { %v337_v36 = vmul.f32 %v982_v33, %v328_v35  ;;  %v340_v38 = vadd.f32 %v338_v34, %v1176_v5 }
 0x24e   :  { %v339_v37 = vadd.f32 %v337_v36, %v1155_v2 }
 0x250   :  { %937 = vmatprep.mubr.msk.f32.mxu1 %vm65_vm0, %v339_v37 }
 0x251   :  { %938 = vmatmul.mubr.msk.f32.vlgmr.msra.gmra.mxu1 %vm65_vm0, %v340_v38 }
 0x252   :  { %952 = vmatpush3.msra.mxu1 %v1187_v10 }
 0x311   :  { %v939_v43 = vpop.f32.mrf.mxu1 }
 0x312   :  { %v427_v45 = vadd.f32 %v939_v43, %v1243_v41 }
 0x313   :  { %v417_v46 = vpop.f32.mrf.mxu1 }
 0x314   :  { %983 = vtanh.f32 %v427_v45  ;;  %v426_v47 = vadd.f32 %v417_v46, %v1245_v44  ;;  %v857_v51 = vmul.f32 -1.442695, %v427_v45 }
 0x316   :  { %985 = vtanh.f32 %v426_v47  ;;  %v856_v50 = vmul.f32 -1.442695, %v426_v47 }
 0x318   :  { %987 = vpow2.f32 %v856_v50 }
 0x319   :  { %989 = vpow2.f32 %v857_v51 }
 0x321   :  { %v984_v48 = vpop.eup %983 }
 0x322   :  { %448 = vrot.lane.b32.xlu1 %v984_v48, %s1093_s26 }
 0x323   :  { %v986_v49 = vpop.eup %985 }
 0x324   :  { %446 = vrot.lane.b32.xlu0 %v986_v49, %s1093_s26 }
 0x325   :  { %v988_v52 = vpop.eup %987 }
 0x326   :  { %v434_v53 = vadd.f32 1.0, %v988_v52  ;;  %v990_v54 = vpop.eup %989 }
 0x327   :  { %v435_v55 = vadd.f32 1.0, %v990_v54 }
 0x328   :  { %991 = vrcp.f32 %v434_v53 }
 0x329   :  { %993 = vrcp.f32 %v435_v55 }
 0x335   :  { %v992_v56 = vpop.eup %991 }
 0x336   :  { %v994_v60 = vpop.eup %993  ;;  %v442_v62 = vmul.f32 0.0, %v992_v56 }
 0x337   :  { %v443_v1 = vmul.f32 0.0, %v994_v60 }
 0x394   :  { %v449_v59 = vpop.permute.xlu1 %448 }
 0x395   :  { %v453_v61 = vmul.f32 %v994_v60, %v449_v59 }
 0x396   :  { %v447_v57 = vpop.permute.xlu0 %446 }
 0x397   :  { %v452_v58 = vmul.f32 %v992_v56, %v447_v57 }
 0x399   :  { %456 = vrot.lane.b32.xlu1 %v452_v58, %s1094_s5 }
 0x39d   :  { %458 = vrot.lane.b32.xlu1 %v453_v61, %s1094_s5 }
 0x40b   :  { %v457_v63 = vpop.permute.xlu1 %456 }
 0x40c   :  { %v1253_v0 = vadd.f32 %v457_v63, %v442_v62 }
 0x40e   :  { %995 = vtanh.f32 %v1253_v0 }
 0x40f   :  { %v459_v3 = vpop.permute.xlu1 %458 }
 0x410   :  { %v1256_v4 = vadd.f32 %v459_v3, %v443_v1 }
 0x412   :  { %997 = vtanh.f32 %v1256_v4 }
 0x41b   :  { %v996_v6 = vpop.eup %995 }
 0x41c   :  { %468 = vrot.lane.b32.xlu0 %v996_v6, %s1093_s26 }
 0x41f   :  { %v998_v7 = vpop.eup %997 }
 0x420   :  { %470 = vrot.lane.b32.xlu1 %v998_v7, %s1093_s26  ;;  %476 = vrot.lane.b32.xlu0 %v1155_v2, %s1095_s27 }
 0x424   :  { %478 = vrot.lane.b32.xlu1 %v1176_v5, %s1095_s27 }
 0x48e   :  { %v469_v8 = vpop.permute.xlu0 %468 }
 0x48f   :  { %v474_v9 = vmul.f32 %v992_v56, %v469_v8 }
 0x492   :  { %v471_v10 = vpop.permute.xlu1 %470  ;;  %v1265_v11 = vpop.permute.xlu0 %476 }
 0x493   :  { %v482_v12 = vadd.f32 %v1265_v11, %v474_v9  ;;  %v475_v13 = vmul.f32 %v994_v60, %v471_v10 }
 0x495   :  { %486 = vrot.lane.b32.xlu0 %v482_v12, %s1094_s5 }
 0x496   :  { %v1269_v14 = vpop.permute.xlu1 %478 }
 0x497   :  { %v483_v15 = vadd.f32 %v1269_v14, %v475_v13 }
 0x499   :  { %488 = vrot.lane.b32.xlu1 %v483_v15, %s1094_s5 }
 0x507   :  { %v487_v2 = vpop.permute.xlu0 %486 }
 0x508   :  { %948 = vmatprep.mubr.msk.f32.mxu0 %vm65_vm0, %v487_v2 }
 0x50b   :  { %v489_v5 = vpop.permute.xlu1 %488 }
 0x50c   :  { %949 = vmatmul.mubr.msk.f32.vlgmr.msra.gmra.mxu0 %vm65_vm0, %v489_v5 }
 0x50d   :  { %957 = vmatpush3.msra.mxu0 %v1204_v24 }
 0x50e   :  { %958 = vmatprep.subr.mxu0 %v1211_v26 }
 0x50f   :  { %959 = vmatpush3.msra.mxu0 %v1211_v26 }
 0x510   :  { %960 = vmatprep.subr.mxu0 %v1215_v27 }
 0x511   :  { %961 = vmatpush3.msra.mxu0 %v1215_v27 }
 0x512   :  { %962 = vmatprep.subr.mxu0 %v1221_v28 }
 0x513   :  { %963 = vmatpush3.msra.mxu0 %v1221_v28 }
 0x5cc   :  { %v950_v16 = vpop.f32.mrf.mxu0 }
 0x5cd   :  { %v572_v17 = vsel %vm234_vm1, %v950_v16, -inf }
 0x5ce   :  { %573 = vmax.xlane.f32.xlu1 %v572_v17  ;;  %v560_v18 = vpop.f32.mrf.mxu0 }
 0x5cf   :  { %v569_v19 = vsel %vm234_vm1, %v560_v18, -inf }
 0x5d0   :  { %570 = vmax.xlane.f32.xlu0 %v569_v19 }
 0x657   :  { %v574_v20 = vpop.xlane.xlu1 %573 }
 0x658   :  { %v576_v21 = vsub.f32 %v950_v16, %v574_v20 }
 0x659   :  { %v571_v22 = vpop.xlane.xlu0 %570 }
 0x65a   :  { %v575_v23 = vsub.f32 %v560_v18, %v571_v22  ;;  %v579_v24 = vmul.f32 1.442695, %v576_v21 }
 0x65c   :  { %v577_v25 = vmul.f32 1.442695, %v575_v23 }
 0x65e   :  { %999 = vpow2.f32 %v577_v25 }
 0x65f   :  { %1001 = vpow2.f32 %v579_v24 }
 0x66b   :  { %v1000_v26 = vpop.eup %999 }
 0x66c   :  { %v1002_v27 = vpop.eup %1001  ;;  %953 = vmatprep.mubr.msk.f32.mxu1 %vm234_vm1, %v1000_v26  ;;  %v581_v28 = vsel %vm234_vm1, %v1000_v26, 0.0 }
 0x66d   :  { %954 = vmatmul.mubr.msk.f32.vlgmr.msra.gmra.mxu1 %vm234_vm1, %v1002_v27  ;;  %582 = vadd.xlane.f32.xlu0 %v581_v28  ;;  %v584_v29 = vsel %vm234_vm1, %v1002_v27, 0.0 }
 0x671   :  { %585 = vadd.xlane.f32.xlu0 %v584_v29 }
 0x6f6   :  { %v583_v30 = vpop.xlane.xlu0 %582 }
 0x6fa   :  { %v586_v31 = vpop.xlane.xlu0 %585 }
 0x6fb   :  { %1003 = vrcp.f32 %v586_v31 }
 0x6fc   :  { %1005 = vrcp.f32 %v583_v30 }
 0x708   :  { %v1004_v32 = vpop.eup %1003 }
 0x709   :  { %v1006_v35 = vpop.eup %1005 }
 0x72d   :  { %v955_v33 = vpop.f32.mrf.mxu1 }
 0x72e   :  { %v671_v34 = vmul.f32 %v1004_v32, %v955_v33 }
 0x72f   :  { %v661_v36 = vpop.f32.mrf.mxu1 }
 0x730   :  { %v670_v37 = vmul.f32 %v1006_v35, %v661_v36  ;;  %676 = vrot.lane.b32.xlu1 %v671_v34, %s1095_s27 }
 0x732   :  { %674 = vrot.lane.b32.xlu0 %v670_v37, %s1095_s27 }
 0x7a2   :  { %v677_v40 = vpop.permute.xlu1 %676 }
 0x7a3   :  { %v681_v42 = vadd.f32 %v677_v40, %v483_v15 }
 0x7a4   :  { %v675_v38 = vpop.permute.xlu0 %674 }
 0x7a5   :  { %v680_v39 = vadd.f32 %v675_v38, %v482_v12 }
 0x7a7   :  { %684 = vrot.lane.b32.xlu1 %v680_v39, %s1094_s5 }
 0x7ab   :  { %686 = vrot.lane.b32.xlu1 %v681_v42, %s1094_s5 }
 0x819   :  { %v685_v43 = vpop.permute.xlu1 %684 }
 0x81a   :  { %964 = vmatprep.mubr.msk.f32.mxu0 %vm65_vm0, %v685_v43 }
 0x81d   :  { %v687_v45 = vpop.permute.xlu1 %686 }
 0x81e   :  { %965 = vmatmul.mubr.msk.f32.vlgmr.msra.gmra.mxu0 %vm65_vm0, %v687_v45 }
 0x8de   :  { %v966_v46 = vpop.f32.mrf.mxu0 }
 0x8df   :  { %v768_v47 = vadd.f32 %v966_v46, %v1243_v41 }
 0x8e0   :  { %v758_v48 = vpop.f32.mrf.mxu0 }
 0x8e1   :  { %1007 = vtanh.f32 %v768_v47  ;;  %v767_v49 = vadd.f32 %v758_v48, %v1245_v44  ;;  %v865_v52 = vmul.f32 -1.442695, %v768_v47 }
 0x8e3   :  { %1009 = vtanh.f32 %v767_v49  ;;  %v864_v53 = vmul.f32 -1.442695, %v767_v49 }
 0x8e4   :  { %1011 = vpow2.f32 %v865_v52 }
 0x8e5   :  { %1013 = vpow2.f32 %v864_v53 }
 0x8ee   :  { %v1008_v50 = vpop.eup %1007 }
 0x8ef   :  { %789 = vrot.lane.b32.xlu1 %v1008_v50, %s1093_s26 }
 0x8f0   :  { %v1010_v51 = vpop.eup %1009 }
 0x8f1   :  { %787 = vrot.lane.b32.xlu0 %v1010_v51, %s1093_s26  ;;  %v1012_v54 = vpop.eup %1011 }
 0x8f2   :  { %v1014_v55 = vpop.eup %1013  ;;  %v776_v56 = vadd.f32 1.0, %v1012_v54 }
 0x8f3   :  { %v775_v57 = vadd.f32 1.0, %v1014_v55 }
 0x8f4   :  { %1015 = vrcp.f32 %v776_v56 }
 0x8f5   :  { %1017 = vrcp.f32 %v775_v57 }
 0x901   :  { %v1016_v41 = vpop.eup %1015 }
 0x902   :  { %v1018_v59 = vpop.eup %1017  ;;  %v784_v62 = vmul.f32 %v1016_v41, %v1256_v4 }
 0x903   :  { %v783_v3 = vmul.f32 %v1018_v59, %v1253_v0 }
 0x961   :  { %v790_v58 = vpop.permute.xlu1 %789 }
 0x962   :  { %v794_v44 = vmul.f32 %v1016_v41, %v790_v58 }
 0x963   :  { %v788_v60 = vpop.permute.xlu0 %787 }
 0x964   :  { %799 = vrot.lane.b32.xlu1 %v794_v44, %s1094_s5  ;;  %v793_v61 = vmul.f32 %v1018_v59, %v788_v60 }
 0x966   :  { %797 = vrot.lane.b32.xlu0 %v793_v61, %s1094_s5 }
 0x9d6   :  { %v800_v63 = vpop.permute.xlu1 %799 }
 0x9d7   :  { %v804_v1 = vadd.f32 %v800_v63, %v784_v62 }
 0x9d8   :  { %v798_v6 = vpop.permute.xlu0 %797 }
 0x9d9   :  { %1019 = vtanh.f32 %v804_v1  ;;  %v803_v7 = vadd.f32 %v798_v6, %v783_v3 }
 0x9db   :  { %1021 = vtanh.f32 %v803_v7 }
 0x9e6   :  { %v1020_v8 = vpop.eup %1019 }
 0x9e7   :  { %811 = vrot.lane.b32.xlu1 %v1020_v8, %s1093_s26 }
 0x9e8   :  { %v1022_v9 = vpop.eup %1021 }
 0x9e9   :  { %809 = vrot.lane.b32.xlu0 %v1022_v9, %s1093_s26 }
 0xa59   :  { %v812_v10 = vpop.permute.xlu1 %811 }
 0xa5a   :  { %v816_v12 = vmul.f32 %v1016_v41, %v812_v10 }
 0xa5b   :  { %v810_v15 = vpop.permute.xlu0 %809 }
 0xa5c   :  { %v818_v13 = vadd.f32 %v816_v12, %v1269_v14  ;;  %v815_v4 = vmul.f32 %v1018_v59, %v810_v15 }
 0xa5e   :  { %823 = vrot.lane.b32.xlu1 %v818_v13, %s1094_s5  ;;  %v817_v0 = vadd.f32 %v815_v4, %v1265_v11 }
 0xa60   :  { %821 = vrot.lane.b32.xlu0 %v817_v0, %s1094_s5 }
 0xad0   :  { %v824_v2 = vpop.permute.xlu1 %823 }
 0xad1   :  { %828 = vst.msk [vmem:[#allocation7 + $0x8] sm:$0xff] %vm65_vm0, %v824_v2 }
 0xad2   :  { %v822_v5 = vpop.permute.xlu0 %821 }
 0xad3   :  { %827 = vst.msk [vmem:[#allocation7] sm:$0xff] %vm65_vm0, %v822_v5 }
 0xad4   :  { %1074 = shalt.err (!%p1071_p0)
}
 0xad5   :  { %840 = dma.vmem_to_hbm [thread:$0]  %s835_s29, 256, %s1322_s6, [#allocation4], %s1090_s24, %s1090_s24, %s1091_s25  }
 0xad6   :  { %1087 = dma.done.wait [#allocation4], 256  }
 0xad7   :  { %1088 = vsyncadd [#allocation4], 4294967040 }
 0xad8   :  { %844 = vsyncpa [#allocation3], 1 }
 0xad9   :  { %845 = vsyncpa [#allocation6], 1 }
 0xada   :  { %846 = vsyncpa [#allocation4], 1 }

</bundles_post_ra>
